<compile_context>
chip_gen: v5e
topology: v5e:2x2
jax: 0.10.0
libtpu: 0.0.40
codegen_flags: <defaults>
</compile_context>

<pallas_src>
import functools

import jax
import jax.numpy as jnp
from jax.experimental import pallas as pl
from jax.experimental.pallas import tpu as pltpu

GAMMA = 1.5
ALPHA = 0.25
LANE = 128
SUBLANE = 8


def _focal_loss_kernel(pred_ref, true_ref, out_ref, *, gamma, alpha):
    s = pl.program_id(1)  # reduction step within this chunk

    @pl.when(s == 0)
    def _():
        out_ref[...] = jnp.zeros_like(out_ref)

    x = pred_ref[...].astype(jnp.float32)
    y = true_ref[...].astype(jnp.float32)

    # Numerically stable BCE-with-logits (reduction='none'):
    #   bce = max(x, 0) - x*y + log1p(exp(-|x|))
    e = jnp.exp(-jnp.abs(x))                      # single exp, reused below
    bce = jnp.maximum(x, 0.0) - x * y + jnp.log1p(e)

    # sigmoid(x) rebuilt from exp(-|x|): sigmoid(|x|) = 1/(1+e).
    # (Exact divide kept instead of pl.reciprocal(approx=True) to stay
    # within the rtol=1e-5 reference tolerance.)
    sig_abs = 1.0 / (1.0 + e)
    p = jnp.where(x >= 0.0, sig_abs, 1.0 - sig_abs)

    # Fused algebra: base = 1 - p_t = y + p - 2*y*p,
    #                alpha_factor = (1-alpha) + (2*alpha - 1)*y.
    base = y + p - 2.0 * (y * p)
    alpha_factor = (1.0 - alpha) + (2.0 * alpha - 1.0) * y
    if gamma == 1.5:
        # (1 - p_t) ** 1.5 == base * sqrt(base); exactly 0 at base == 0.
        modulating = base * jnp.sqrt(base)
    else:
        # Generic pow path for non-default gamma (guarded so 0**gamma -> 0).
        modulating = jnp.where(
            base > 0.0,
            jnp.exp(gamma * jnp.log(jnp.maximum(base, 1e-30))),
            0.0)
    loss = bce * alpha_factor * modulating

    # Lane/sublane-resident partial sums, accumulated directly in the output
    # block: only VPU adds on the hot path; the cross-lane reduce happens
    # once, outside the kernel.  Reshape keeps (8,128) tile boundaries.
    out_ref[...] += jnp.sum(loss.reshape(-1, SUBLANE, LANE), axis=0)


def _focal_elemwise(x, y, gamma, alpha):
    """Plain-JAX per-element focal loss (used for the unaligned tail)."""
    x = x.astype(jnp.float32)
    y = y.astype(jnp.float32)
    bce = jnp.maximum(x, 0.0) - x * y + jnp.log1p(jnp.exp(-jnp.abs(x)))
    p = jax.nn.sigmoid(x)
    base = y + p - 2.0 * (y * p)
    af = (1.0 - alpha) + (2.0 * alpha - 1.0) * y
    if gamma == 1.5:
        mf = base * jnp.sqrt(base)
    else:
        mf = base ** gamma
    return bce * af * mf


def focal_loss(pred, true, gamma=GAMMA, alpha=ALPHA, block_rows=2048,
               num_chunks=1, vmem_limit_bytes=None):
    """FocalLoss(BCEWithLogitsLoss(reduction='mean')) forward pass.

    num_chunks: set to the number of TensorCores (2 on v7x, 1 on v5e/v6e).
    block_rows: rows (of 128 lanes) per tile; raise to 4096 on v7x together
                with vmem_limit_bytes if desired.
    """
    assert pred.shape == true.shape
    total = int(pred.size)

    pflat = pred.reshape(-1)
    tflat = true.reshape(-1)

    # Sublane alignment: f32 packs 8 rows / vreg, bf16 packs 16.
    sub = 16 if (pred.dtype == jnp.bfloat16 or true.dtype == jnp.bfloat16) \
        else SUBLANE
    rows = total // LANE                       # number of complete 128-lane rows
    br = min(block_rows, rows)
    br = (br // sub) * sub                     # force multiple of sublane pack

    main_rows = 0
    steps = 0
    if br >= sub:
        main_rows = (rows // (num_chunks * br)) * (num_chunks * br)
        steps = main_rows // (num_chunks * br) if main_rows else 0

    loss_sum = jnp.float32(0.0)

    if main_rows > 0:
        main_elems = main_rows * LANE
        p_main = pflat if main_elems == total else pflat[:main_elems]
        t_main = tflat if main_elems == total else tflat[:main_elems]
        pred2d = p_main.reshape(main_rows, LANE)
        true2d = t_main.reshape(main_rows, LANE)

        kernel = functools.partial(_focal_loss_kernel, gamma=gamma, alpha=alpha)

        partials = pl.pallas_call(
            kernel,
            out_shape=jax.ShapeDtypeStruct((num_chunks, SUBLANE, LANE),
                                           jnp.float32),
            grid_spec=pltpu.PrefetchScalarGridSpec(
                num_scalar_prefetch=0,
                grid=(num_chunks, steps),
                in_specs=[
                    pl.BlockSpec((br, LANE), lambda c, s: (c * steps + s, 0)),
                    pl.BlockSpec((br, LANE), lambda c, s: (c * steps + s, 0)),
                ],
                # First dim squeezed; index_map ignores s -> block stays
                # resident across the reduction axis (accumulator).
                out_specs=pl.BlockSpec((None, SUBLANE, LANE),
                                       lambda c, s: (c, 0, 0)),
            ),
            compiler_params=pltpu.CompilerParams(
                dimension_semantics=("parallel", "arbitrary"),
                vmem_limit_bytes=vmem_limit_bytes),
        )(pred2d, true2d)

        loss_sum = loss_sum + jnp.sum(partials)

    # Unaligned tail (< num_chunks*block_rows*128 elements): plain JAX, no
    # pad copy and no per-tile mask in the kernel.
    tail_elems = total - main_rows * LANE
    if tail_elems > 0:
        off = main_rows * LANE
        loss_sum = loss_sum + jnp.sum(
            _focal_elemwise(pflat[off:], tflat[off:], gamma, alpha))

    # reduction == 'mean' (default of BCEWithLogitsLoss): divide by the true
    # element count.
    return loss_sum / jnp.float32(total)


def focal_loss_ref(pred, true, gamma=GAMMA, alpha=ALPHA):
    x = pred.astype(jnp.float32)
    y = true.astype(jnp.float32)
    bce = jnp.maximum(x, 0.0) - x * y + jnp.log1p(jnp.exp(-jnp.abs(x)))
    p = jax.nn.sigmoid(x)
    p_t = y * p + (1 - y) * (1 - p)
    af = y * alpha + (1 - y) * (1 - alpha)
    mf = (1.0 - p_t) ** gamma
    return jnp.mean(bce * af * mf)


if __name__ == "__main__":
    key = jax.random.PRNGKey(0)
    k1, k2, k3, k4 = jax.random.split(key, 4)

    # NCHW detection-head-like tensor, 128-lane aligned (pure kernel path).
    pred = jax.random.normal(k1, (2, 4, 16, 16), dtype=jnp.float32)
    true = (jax.random.uniform(k2, (2, 4, 16, 16)) > 0.5).astype(jnp.float32)
    out = jax.block_until_ready(focal_loss(pred, true))
    ref = focal_loss_ref(pred, true)
    assert jnp.allclose(out, ref, rtol=1e-5, atol=1e-6), (out, ref)

    # YOLO-ish 40x40 head: exercises kernel prefix + plain-JAX tail path.
    pred2 = jax.random.normal(k3, (2, 3, 40, 40), dtype=jnp.float32)
    true2 = (jax.random.uniform(k4, (2, 3, 40, 40)) > 0.5).astype(jnp.float32)
    out2 = jax.block_until_ready(focal_loss(pred2, true2))
    ref2 = focal_loss_ref(pred2, true2)
    assert jnp.allclose(out2, ref2, rtol=1e-5, atol=1e-6), (out2, ref2)

    print("KERNEL_OK")
</pallas_src>

<mosaic_0001>
module attributes {stable_mosaic.version = 11 : i64} {
  func.func @_focal_loss_kernel(%arg0: i32, %arg1: i32, %arg2: memref<16x128xf32, #tpu.memory_space<vmem>>, %arg3: memref<16x128xf32, #tpu.memory_space<vmem>>, %arg4: memref<1x8x128xf32, #tpu.memory_space<vmem>>) attributes {dimension_semantics = [#tpu.dimension_semantics<parallel>, #tpu.dimension_semantics<arbitrary>], iteration_bounds = array<i64: 1, 1>, scalar_prefetch = 0 : i64, scratch_operands = 0 : i64, tpu.core_type = #tpu.core_type<tc>, window_params = [{transform_indices = @transform_0, window_bounds = array<i64: 16, 128>}, {transform_indices = @transform_1, window_bounds = array<i64: 16, 128>}, {transform_indices = @transform_2, window_bounds = array<i64: 1, 8, 128>}]} {
    %c0_i32 = arith.constant 0 : i32
    %0 = arith.cmpi eq, %arg1, %c0_i32 : i32
    %1 = arith.extui %0 : i1 to i32
    %c0_i32_0 = arith.constant 0 : i32
    %2 = arith.cmpi ne, %1, %c0_i32_0 : i32
    scf.if %2 {
      %cst_19 = arith.constant 0.000000e+00 : f32
      %45 = vector.broadcast %cst_19 : f32 to vector<8x128xf32>
      %c0_20 = arith.constant 0 : index
      %c0_21 = arith.constant 0 : index
      %c0_22 = arith.constant 0 : index
      %46 = vector.load %arg4[%c0_20, %c0_21, %c0_22] : memref<1x8x128xf32, #tpu.memory_space<vmem>>, vector<1x8x128xf32>
      %47 = vector.shape_cast %46 : vector<1x8x128xf32> to vector<8x128xf32>
      %48 = vector.shape_cast %45 : vector<8x128xf32> to vector<1x8x128xf32>
      tpu.vector_store %arg4[%c0_20, %c0_21, %c0_22], %48 {strides = array<i32>} : memref<1x8x128xf32, #tpu.memory_space<vmem>>, vector<1x8x128xf32>,
    } else {
    }
    %c0 = arith.constant 0 : index
    %c0_1 = arith.constant 0 : index
    %3 = vector.load %arg2[%c0, %c0_1] : memref<16x128xf32, #tpu.memory_space<vmem>>, vector<16x128xf32>
    %c0_2 = arith.constant 0 : index
    %c0_3 = arith.constant 0 : index
    %4 = vector.load %arg3[%c0_2, %c0_3] : memref<16x128xf32, #tpu.memory_space<vmem>>, vector<16x128xf32>
    %5 = math.absf %3 : vector<16x128xf32>
    %cst = arith.constant 0.000000e+00 : f32
    %6 = vector.broadcast %cst : f32 to vector<16x128xf32>
    %7 = arith.subf %6, %5 : vector<16x128xf32>
    %8 = math.exp %7 : vector<16x128xf32>
    %cst_4 = arith.constant 0.000000e+00 : f32
    %9 = vector.broadcast %cst_4 : f32 to vector<16x128xf32>
    %10 = arith.maximumf %3, %9 : vector<16x128xf32>
    %11 = arith.mulf %3, %4 : vector<16x128xf32>
    %12 = arith.subf %10, %11 : vector<16x128xf32>
    %13 = math.log1p %8 : vector<16x128xf32>
    %14 = arith.addf %12, %13 : vector<16x128xf32>
    %cst_5 = arith.constant 1.000000e+00 : f32
    %15 = vector.broadcast %cst_5 : f32 to vector<16x128xf32>
    %16 = arith.addf %15, %8 : vector<16x128xf32>
    %cst_6 = arith.constant 1.000000e+00 : f32
    %17 = vector.broadcast %cst_6 : f32 to vector<16x128xf32>
    %18 = arith.divf %17, %16 : vector<16x128xf32>
    %cst_7 = arith.constant 0.000000e+00 : f32
    %19 = vector.broadcast %cst_7 : f32 to vector<16x128xf32>
    %20 = arith.cmpf oge, %3, %19 : vector<16x128xf32>
    %cst_8 = arith.constant 1.000000e+00 : f32
    %21 = vector.broadcast %cst_8 : f32 to vector<16x128xf32>
    %22 = arith.subf %21, %18 : vector<16x128xf32>
    %23 = arith.select %20, %18, %22 : vector<16x128xi1>, vector<16x128xf32>
    %24 = arith.addf %4, %23 : vector<16x128xf32>
    %25 = arith.mulf %4, %23 : vector<16x128xf32>
    %cst_9 = arith.constant 2.000000e+00 : f32
    %26 = vector.broadcast %cst_9 : f32 to vector<16x128xf32>
    %27 = arith.mulf %26, %25 : vector<16x128xf32>
    %28 = arith.subf %24, %27 : vector<16x128xf32>
    %cst_10 = arith.constant -5.000000e-01 : f32
    %29 = vector.broadcast %cst_10 : f32 to vector<16x128xf32>
    %30 = arith.mulf %29, %4 : vector<16x128xf32>
    %cst_11 = arith.constant 7.500000e-01 : f32
    %31 = vector.broadcast %cst_11 : f32 to vector<16x128xf32>
    %32 = arith.addf %31, %30 : vector<16x128xf32>
    %33 = math.sqrt %28 : vector<16x128xf32>
    %34 = arith.mulf %28, %33 : vector<16x128xf32>
    %35 = arith.mulf %14, %32 : vector<16x128xf32>
    %36 = arith.mulf %35, %34 : vector<16x128xf32>
    %c0_12 = arith.constant 0 : index
    %c0_13 = arith.constant 0 : index
    %c0_14 = arith.constant 0 : index
    %37 = vector.load %arg4[%c0_12, %c0_13, %c0_14] : memref<1x8x128xf32, #tpu.memory_space<vmem>>, vector<1x8x128xf32>
    %38 = vector.shape_cast %37 : vector<1x8x128xf32> to vector<8x128xf32>
    %39 = vector.shape_cast %36 : vector<16x128xf32> to vector<2x8x128xf32>
    %cst_15 = arith.constant dense<0.000000e+00> : vector<8x128xf32>
    %40 = vector.multi_reduction <add>, %39, %cst_15 [0] : vector<2x8x128xf32> to vector<8x128xf32>
    %41 = arith.addf %38, %40 : vector<8x128xf32>
    %c0_16 = arith.constant 0 : index
    %c0_17 = arith.constant 0 : index
    %c0_18 = arith.constant 0 : index
    %42 = vector.load %arg4[%c0_16, %c0_17, %c0_18] : memref<1x8x128xf32, #tpu.memory_space<vmem>>, vector<1x8x128xf32>
    %43 = vector.shape_cast %42 : vector<1x8x128xf32> to vector<8x128xf32>
    %44 = vector.shape_cast %41 : vector<8x128xf32> to vector<1x8x128xf32>
    tpu.vector_store %arg4[%c0_16, %c0_17, %c0_18], %44 {strides = array<i32>} : memref<1x8x128xf32, #tpu.memory_space<vmem>>, vector<1x8x128xf32>,
    return
  }
  func.func @transform_0(%arg0: i32, %arg1: i32) -> (i32, i32) {
    %c1_i32 = arith.constant 1 : i32
    %0 = arith.muli %arg0, %c1_i32 : i32
    %1 = arith.addi %0, %arg1 : i32
    %c0_i32 = arith.constant 0 : i32
    %c0_i32_0 = arith.constant 0 : i32
    return %1, %c0_i32 : i32, i32
  }
  func.func @transform_1(%arg0: i32, %arg1: i32) -> (i32, i32) {
    %c1_i32 = arith.constant 1 : i32
    %0 = arith.muli %arg0, %c1_i32 : i32
    %1 = arith.addi %0, %arg1 : i32
    %c0_i32 = arith.constant 0 : i32
    %c0_i32_0 = arith.constant 0 : i32
    return %1, %c0_i32 : i32, i32
  }
  func.func @transform_2(%arg0: i32, %arg1: i32) -> (i32, i32, i32) {
    %c0_i32 = arith.constant 0 : i32
    %c0_i32_0 = arith.constant 0 : i32
    %c0_i32_1 = arith.constant 0 : i32
    return %arg0, %c0_i32, %c0_i32_0 : i32, i32, i32
  }
}

</mosaic_0001>

<bundles_post_ra>
// kernel: tpu_custom_call.1
= control target key start
LH: loop header
LB: loop body
LE: loop exit
PB: predicated region body
PF: predicated region fallthrough
CT: control target
= control target key end

     0   :  { %7 = vsyncpa [#allocation3], 0  ;;  %s366_s0 = inlined_call_operand.hbm [shape: f32[16,128], index: 0, kind: input, shape index: {}]   ;;  %s367_s1 = inlined_call_operand.hbm [shape: f32[16,128], index: 1, kind: input, shape index: {}]   ;;  %s368_s2 = inlined_call_operand.hbm [shape: f32[1,8,128], index: 2, kind: output, shape index: {}]  }
   0x1   :  { %8 = vsyncpa [#allocation6], 0 }
   0x2   :  { %9 = vsyncpa [#allocation4], 0  ;;  %s18_s11 = sshll.u32 %s366_s0, 4  ;;  %s301_s12 = smov [#allocation2]   ;;  %s19_s11 = int_to_ptr.hbm [resolvable:$true] %s18_s11 }
   0x3   :  { %s20_s13 = sshll.u32 %s301_s12, 4  ;;  %s35_s16 = sshll.u32 %s367_s1, 4  ;;  %s21_s13 = int_to_ptr.vmem [resolvable:$true] %s20_s13  ;;  %s36_s16 = int_to_ptr.hbm [resolvable:$true] %s35_s16 }
   0x4   :  { %s302_s17 = smov 128   ;;  %s303_s18 = smov 8  }
   0x5   :  { %26 = dma.hbm_to_vmem [thread:$0]  %s19_s11, 256, %s21_s13, [#allocation3], %s302_s17, %s302_s17, %s303_s18  }
   0x6   :  { %s304_s19 = smov [#allocation5]  }
   0x7   :  { %s37_s20 = sshll.u32 %s304_s19, 4  ;;  %s38_s20 = int_to_ptr.vmem [resolvable:$true] %s37_s20 }
   0x8   :  { %43 = dma.hbm_to_vmem [thread:$0]  %s36_s16, 256, %s38_s20, [#allocation6], %s302_s17, %s302_s17, %s303_s18  }
   0x9   :  { %295 = dma.done.wait [#allocation3], 256  }
   0xa   :  { %296 = vsyncadd [#allocation3], 4294967040 }
   0xb   :  { %297 = dma.done.wait [#allocation6], 256  }
   0xc   :  { %298 = vsyncadd [#allocation6], 4294967040  ;;  %v327_v0 = vld [vmem:[#allocation2] sm:$0xff]  ;;  %v329_v1 = vld [vmem:[#allocation2 + $0x8] sm:$0xff]  ;;  %s305_s0 = smov [#allocation7]   ;;  %s190_s23 = sshll.u32 %s368_s2, 4  ;;  %s191_s23 = int_to_ptr.hbm [resolvable:$true] %s190_s23 }
   0xd   :  { %v65_v2 = vand.u32 2147483647, %v327_v0  ;;  %v66_v3 = vand.u32 2147483647, %v329_v1  ;;  %vm131_vm8 = vcmp.ge.f32.partialorder %v327_v0, 0.0  ;;  %v63_v31 = vld [vmem:[#allocation5] sm:$0xff] }
   0xe   :  { %vm132_vm9 = vcmp.ge.f32.partialorder %v329_v1, 0.0  ;;  %v64_v34 = vld [vmem:[#allocation5 + $0x8] sm:$0xff]  ;;  %v73_v56 = vmax.f32 %v327_v0, 0.0  ;;  %v74_v57 = vmax.f32 %v329_v1, 0.0  ;;  %v75_v58 = vmul.f32 %v63_v31, %v327_v0  ;;  %s188_s1 = sshll.u32 %s305_s0, 4  ;;  %s189_s1 = int_to_ptr.vmem [resolvable:$true] %s188_s1 }
   0xf   :  { %v67_v4 = vsub.f32 0.0, %v65_v2  ;;  %v68_v5 = vsub.f32 0.0, %v66_v3  ;;  %v76_v60 = vmul.f32 %v64_v34, %v329_v1  ;;  %v146_v1 = vmul.f32 -0.5, %v64_v34 }
  0x11   :  { %v69_v6 = vmul.f32 1.442695, %v67_v4  ;;  %v71_v7 = vmul.f32 1.442695, %v68_v5 }
  0x13   :  { %207 = vpow2.f32 %v69_v6 }
  0x14   :  { %209 = vpow2.f32 %v71_v7  ;;  %v77_v7 = vsub.f32 %v73_v56, %v75_v58 }
  0x19   :  { %v333_v8 = vpop.eup %207 }
  0x1a   :  { %v335_v9 = vpop.eup %209  ;;  %v79_v10 = vadd.f32 1.0, %v333_v8  ;;  %v82_v46 = vmul.f32 -0.5, %v333_v8  ;;  %v85_v51 = vand.u32 2147483647, %v333_v8 }
  0x1b   :  { %v88_v11 = vadd.f32 1.0, %v335_v9  ;;  %v91_v47 = vmul.f32 -0.5, %v335_v9  ;;  %v94_v54 = vand.u32 2147483647, %v335_v9 }
  0x1c   :  { %211 = vrcp.f32 %v79_v10  ;;  %vm106_vm0 = vweird.f32 %v79_v10  ;;  %v112_v15 = vand.u32 2147483648, %v79_v10  ;;  %v110_v18 = vand.u32 2147483647, %v79_v10 }
  0x1d   :  { %213 = vrcp.f32 %v88_v11  ;;  %v127_v19 = vand.u32 2147483648, %v88_v11  ;;  %vm121_vm2 = vweird.f32 %v88_v11  ;;  %v125_v21 = vand.u32 2147483647, %v88_v11 }
  0x1e   :  { %v113_v23 = vor.u32 1.1754944e-38, %v112_v15  ;;  %vm111_vm5 = vcmp.eq.f32.partialorder %v110_v18, 8.507059e+37  ;;  %215 = vlog2.f32 %v79_v10  ;;  %v83_v49 = vadd.f32 1.0, %v82_v46 }
  0x1f   :  { %v128_v26 = vor.u32 1.1754944e-38, %v127_v19  ;;  %vm126_vm7 = vcmp.eq.f32.partialorder %v125_v21, 8.507059e+37  ;;  %217 = vlog2.f32 %v88_v11  ;;  %v92_v52 = vadd.f32 1.0, %v91_v47 }
  0x20   :  { %v84_v62 = vmul.f32 %v333_v8, %v83_v49  ;;  %vm350_vm10 = vcmp.lt.f32.partialorder %v85_v51, 0.0004427343  ;;  %vm355_vm11 = vcmp.lt.f32.partialorder %v94_v54, 0.0004427343  ;;  %v148_v18 = vadd.f32 0.75, %v146_v1 }
  0x21   :  { %v93_v4 = vmul.f32 %v335_v9, %v92_v52 }
  0x22   :  { %v212_v12 = vpop.eup %211 }
  0x23   :  { %v214_v13 = vpop.eup %213  ;;  %v102_v14 = vmul.f32 %v212_v12, %v79_v10  ;;  %vm107_vm1 = vweird.f32 %v212_v12  ;;  %v145_v10 = vmul.f32 -0.5, %v63_v31 }
  0x24   :  { %v117_v16 = vmul.f32 %v214_v13, %v88_v11  ;;  %vm122_vm3 = vweird.f32 %v214_v13  ;;  %vm108_vm4 = vmor %vm106_vm0, %vm107_vm1  ;;  %v216_v48 = vpop.eup %215 }
  0x25   :  { %v103_v17 = vsub.f32 1.0, %v102_v14  ;;  %vm123_vm6 = vmor %vm121_vm2, %vm122_vm3  ;;  %v218_v50 = vpop.eup %217  ;;  %v81_v61 = vmul.f32 0.6931472, %v216_v48 }
  0x26   :  { %v118_v20 = vsub.f32 1.0, %v117_v16  ;;  %v90_v3 = vmul.f32 0.6931472, %v218_v50 }
  0x27   :  { %v104_v22 = vmul.f32 %v212_v12, %v103_v17  ;;  %v87_v8 = vsel %vm350_vm10, %v84_v62, %v81_v61  ;;  %v147_v17 = vadd.f32 0.75, %v145_v10 }
  0x28   :  { %v119_v24 = vmul.f32 %v214_v13, %v118_v20  ;;  %v96_v14 = vsel %vm355_vm11, %v93_v4, %v90_v3  ;;  %v97_v16 = vadd.f32 %v87_v8, %v77_v7 }
  0x29   :  { %v105_v25 = vadd.f32 %v212_v12, %v104_v22 }
  0x2a   :  { %v120_v27 = vadd.f32 %v214_v13, %v119_v24 }
  0x2b   :  { %v109_v28 = vsel %vm108_vm4, %v212_v12, %v105_v25  ;;  %v78_v12 = vsub.f32 %v74_v57, %v76_v60 }
  0x2c   :  { %v114_v29 = vsel %vm111_vm5, %v113_v23, %v109_v28  ;;  %v124_v30 = vsel %vm123_vm6, %v214_v13, %v120_v27  ;;  %v175_v27 = vmul.f32 %v147_v17, %v97_v16 }
  0x2d   :  { %v129_v32 = vsel %vm126_vm7, %v128_v26, %v124_v30  ;;  %v133_v33 = vsub.f32 1.0, %v114_v29  ;;  %v98_v20 = vadd.f32 %v96_v14, %v78_v12 }
  0x2e   :  { %v134_v35 = vsub.f32 1.0, %v129_v32 }
  0x2f   :  { %v135_v36 = vsel %vm131_vm8, %v114_v29, %v133_v33  ;;  %v176_v30 = vmul.f32 %v148_v18, %v98_v20 }
  0x30   :  { %v136_v37 = vsel %vm132_vm9, %v129_v32, %v134_v35  ;;  %v137_v38 = vadd.f32 %v135_v36, %v63_v31  ;;  %v139_v39 = vmul.f32 %v135_v36, %v63_v31 }
  0x31   :  { %v138_v40 = vadd.f32 %v136_v37, %v64_v34  ;;  %v140_v41 = vmul.f32 %v136_v37, %v64_v34 }
  0x32   :  { %v141_v42 = vmul.f32 2.0, %v139_v39 }
  0x33   :  { %v142_v43 = vmul.f32 2.0, %v140_v41 }
  0x34   :  { %v143_v44 = vsub.f32 %v137_v38, %v141_v42 }
  0x35   :  { %v144_v45 = vsub.f32 %v138_v40, %v142_v43 }
  0x36   :  { %219 = vrsqrt.f32 %v143_v44  ;;  %vm156_vm12 = vcmp.eq.f32.partialorder %v143_v44, inf  ;;  %v159_v21 = vand.u32 2147483648, %v143_v44  ;;  %vm158_vm13 = vcmp.eq.f32.partialorder %v143_v44, 0.0 }
  0x37   :  { %221 = vrsqrt.f32 %v144_v45  ;;  %vm168_vm14 = vcmp.eq.f32.partialorder %v144_v45, inf  ;;  %v171_v24 = vand.u32 2147483648, %v144_v45  ;;  %vm170_vm15 = vcmp.eq.f32.partialorder %v144_v45, 0.0 }
  0x3c   :  { %v220_v53 = vpop.eup %219 }
  0x3d   :  { %v222_v55 = vpop.eup %221  ;;  %v150_v59 = vmul.f32 %v220_v53, %v143_v44 }
  0x3e   :  { %v162_v63 = vmul.f32 %v222_v55, %v144_v45 }
  0x3f   :  { %v151_v5 = vmul.f32 %v220_v53, %v150_v59 }
  0x40   :  { %v163_v0 = vmul.f32 %v222_v55, %v162_v63 }
  0x41   :  { %v152_v11 = vmul.f32 0.5, %v151_v5 }
  0x42   :  { %v164_v13 = vmul.f32 0.5, %v163_v0 }
  0x43   :  { %v153_v15 = vsub.f32 1.5, %v152_v11 }
  0x44   :  { %v165_v9 = vsub.f32 1.5, %v164_v13 }
  0x45   :  { %v154_v19 = vmul.f32 %v220_v53, %v153_v15 }
  0x46   :  { %v166_v22 = vmul.f32 %v222_v55, %v165_v9 }
  0x47   :  { %v155_v23 = vmul.f32 %v154_v19, %v143_v44 }
  0x48   :  { %v167_v25 = vmul.f32 %v166_v22, %v144_v45 }
  0x49   :  { %v157_v26 = vsel %vm156_vm12, %v143_v44, %v155_v23 }
  0x4a   :  { %v160_v28 = vsel %vm158_vm13, %v159_v21, %v157_v26  ;;  %v169_v29 = vsel %vm168_vm14, %v144_v45, %v167_v25 }
  0x4b   :  { %v172_v31 = vsel %vm170_vm15, %v171_v24, %v169_v29  ;;  %v173_v32 = vmul.f32 %v160_v28, %v143_v44 }
  0x4c   :  { %v174_v33 = vmul.f32 %v172_v31, %v144_v45 }
  0x4d   :  { %v177_v34 = vmul.f32 %v175_v27, %v173_v32 }
  0x4e   :  { %v178_v35 = vmul.f32 %v176_v30, %v174_v33 }
  0x50   :  { %v180_v36 = vadd.f32 %v178_v35, %v177_v34 }
  0x52   :  { %182 = vst [vmem:[#allocation7] sm:$0xff] %v180_v36 }
  0x53   :  { %193 = dma.vmem_to_hbm [thread:$0]  %s189_s1, 128, %s191_s23, [#allocation4]  }
  0x54   :  { %299 = dma.done.wait [#allocation4], 128  }
  0x55   :  { %300 = vsyncadd [#allocation4], 4294967168 }
  0x56   :  { %198 = vsyncpa [#allocation3], 1 }
  0x57   :  { %199 = vsyncpa [#allocation6], 1 }
  0x58   :  { %200 = vsyncpa [#allocation4], 1 }

</bundles_post_ra>
